<compile_context>
chip_gen: v5e
topology: v5e:2x2
jax: 0.10.0
libtpu: 0.0.40
codegen_flags: <defaults>
</compile_context>

<pallas_src>
import jax
import jax.numpy as jnp
from jax.experimental import pallas as pl
from jax.experimental.pallas import tpu as pltpu


def _round_up(n, m):
    return ((n + m - 1) // m) * m


def mlp_kernel(x_ref, w1_ref, b1_ref, w2_ref, b2_ref, o_ref):
    # x_ref:  (TB, D_PAD)      bf16
    # w1_ref: (D_PAD, MID_PAD) bf16,  b1_ref: (1, MID_PAD) f32
    # w2_ref: (MID_PAD, C_PAD) bf16,  b2_ref: (1, C_PAD)   f32
    # o_ref:  (TB, C_PAD)      f32
    h = jnp.dot(x_ref[...], w1_ref[...], preferred_element_type=jnp.float32)
    h = jnp.maximum(h + b1_ref[...], 0.0)            # bias + ReLU in f32 (VPU)
    # Dropout(0.5) in eval mode == identity.
    # TODO(synk): training-mode dropout would use pltpu.prng_seed/prng_random_bits.
    y = jnp.dot(h.astype(jnp.bfloat16), w2_ref[...],
                preferred_element_type=jnp.float32)
    o_ref[...] = (y + b2_ref[...]).astype(o_ref.dtype)


def mlps_forward(x, w1, b1, w2, b2, *, batch_tile=256):
    """Forward pass of MLPs: relu(x @ w1 + b1) @ w2 + b2 (eval-mode dropout).

    x: (B, d_in) f32; w1: (d_in, mid); b1: (1, mid); w2: (mid, cls); b2: (1, cls)
    Weights are stored transposed relative to PyTorch nn.Linear.
    """
    B, d_in = x.shape
    mid = w1.shape[1]
    cls = w2.shape[1]

    d_pad = _round_up(d_in, 128)
    mid_pad = _round_up(mid, 128)
    cls_pad = _round_up(cls, 128)

    # Batch tiling: gridless single call for small B; B-tiled grid (tb a
    # multiple of 8 for sublane alignment) once B gets large.
    if _round_up(B, 8) <= batch_tile:
        tb = _round_up(B, 8)
    else:
        tb = batch_tile
    b_pad = _round_up(B, tb)

    # bf16 operand streaming + exact zero padding of contraction / lane dims.
    xp = jnp.zeros((b_pad, d_pad), jnp.bfloat16).at[:B, :d_in].set(
        x.astype(jnp.bfloat16))
    w1p = jnp.zeros((d_pad, mid_pad), jnp.bfloat16).at[:d_in, :mid].set(
        w1.astype(jnp.bfloat16))
    b1p = jnp.zeros((1, mid_pad), jnp.float32).at[:, :mid].set(
        b1.astype(jnp.float32))
    w2p = jnp.zeros((mid_pad, cls_pad), jnp.bfloat16).at[:mid, :cls].set(
        w2.astype(jnp.bfloat16))
    b2p = jnp.zeros((1, cls_pad), jnp.float32).at[:, :cls].set(
        b2.astype(jnp.float32))

    out_shape = jax.ShapeDtypeStruct((b_pad, cls_pad), jnp.float32)

    if b_pad == tb:
        # Small batch: single gridless invocation; whole padded arrays in VMEM.
        out = pl.pallas_call(mlp_kernel, out_shape=out_shape)(
            xp, w1p, b1p, w2p, b2p)
    else:
        # Large batch: tile B; weights/biases VMEM-resident across the grid
        # via constant index_maps; batch axis parallel (megacore on v7x).
        out = pl.pallas_call(
            mlp_kernel,
            out_shape=out_shape,
            grid=(b_pad // tb,),
            in_specs=[
                pl.BlockSpec((tb, d_pad), lambda i: (i, 0)),
                pl.BlockSpec((d_pad, mid_pad), lambda i: (0, 0)),
                pl.BlockSpec((1, mid_pad), lambda i: (0, 0)),
                pl.BlockSpec((mid_pad, cls_pad), lambda i: (0, 0)),
                pl.BlockSpec((1, cls_pad), lambda i: (0, 0)),
            ],
            out_specs=pl.BlockSpec((tb, cls_pad), lambda i: (i, 0)),
            compiler_params=pltpu.CompilerParams(
                dimension_semantics=("parallel",)),
        )(xp, w1p, b1p, w2p, b2p)

    return out[:B, :cls]


if __name__ == "__main__":
    # Module hyper-parameters (consistent with the PyTorch module).
    class_num = 20
    midnum = 128
    nodeNum = 4
    d_in = nodeNum * 63          # 252
    batch = 8

    key = jax.random.PRNGKey(0)
    kx, kw1, kb1, kw2, kb2, kx2 = jax.random.split(key, 6)

    # Deterministic synthetic parameters (PyTorch-Linear-like scale).
    x = jax.random.normal(kx, (batch, d_in), dtype=jnp.float32)
    w1 = jax.random.normal(kw1, (d_in, midnum), dtype=jnp.float32) * (1.0 / (d_in ** 0.5))
    b1 = jax.random.normal(kb1, (1, midnum), dtype=jnp.float32) * 0.01
    w2 = jax.random.normal(kw2, (midnum, class_num), dtype=jnp.float32) * (1.0 / (midnum ** 0.5))
    b2 = jax.random.normal(kb2, (1, class_num), dtype=jnp.float32) * 0.01

    # Small-batch (gridless) path.
    out = jax.block_until_ready(mlps_forward(x, w1, b1, w2, b2))
    ref = jnp.maximum(x @ w1 + b1, 0.0) @ w2 + b2
    assert out.shape == (batch, class_num)
    # bf16 operands (f32 accumulation) -> loosened tolerance vs. f32 reference.
    assert jnp.allclose(out, ref, atol=7.5e-2, rtol=5e-2), float(
        jnp.max(jnp.abs(out - ref)))

    # Also exercise the batch-tiled (grid) path, including B padding.
    x_big = jax.random.normal(kx2, (520, d_in), dtype=jnp.float32)
    out_big = jax.block_until_ready(mlps_forward(x_big, w1, b1, w2, b2))
    ref_big = jnp.maximum(x_big @ w1 + b1, 0.0) @ w2 + b2
    assert out_big.shape == (520, class_num)
    assert jnp.allclose(out_big, ref_big, atol=7.5e-2, rtol=5e-2), float(
        jnp.max(jnp.abs(out_big - ref_big)))

    print("KERNEL_OK")
</pallas_src>

<mosaic_0001>
module attributes {stable_mosaic.version = 11 : i64} {
  func.func @mlp_kernel(%arg0: memref<8x256xbf16, #tpu.memory_space<vmem>>, %arg1: memref<256x128xbf16, #tpu.memory_space<vmem>>, %arg2: memref<1x128xf32, #tpu.memory_space<vmem>>, %arg3: memref<128x128xbf16, #tpu.memory_space<vmem>>, %arg4: memref<1x128xf32, #tpu.memory_space<vmem>>, %arg5: memref<8x128xf32, #tpu.memory_space<vmem>>) attributes {dimension_semantics = [], scalar_prefetch = 0 : i64, scratch_operands = 0 : i64, tpu.core_type = #tpu.core_type<tc>} {
    %c0 = arith.constant 0 : index
    %c0_0 = arith.constant 0 : index
    %0 = vector.load %arg0[%c0, %c0_0] : memref<8x256xbf16, #tpu.memory_space<vmem>>, vector<8x256xbf16>
    %c0_1 = arith.constant 0 : index
    %c0_2 = arith.constant 0 : index
    %1 = vector.load %arg1[%c0_1, %c0_2] : memref<256x128xbf16, #tpu.memory_space<vmem>>, vector<256x128xbf16>
    %cst = arith.constant dense<0.000000e+00> : vector<8x128xf32>
    %2 = tpu.matmul %0, %1, %cst {dimension_numbers = #tpu.dot_dimension_numbers<[1], [0], [0], [1], [0, 0, 1, 1], [], []>} : vector<8x256xbf16>, vector<256x128xbf16>, vector<8x128xf32> -> vector<8x128xf32>
    %c0_3 = arith.constant 0 : index
    %c0_4 = arith.constant 0 : index
    %3 = vector.load %arg2[%c0_3, %c0_4] : memref<1x128xf32, #tpu.memory_space<vmem>>, vector<1x128xf32>
    %4 = vector.broadcast %3 : vector<1x128xf32> to vector<8x128xf32>
    %5 = arith.addf %2, %4 : vector<8x128xf32>
    %cst_5 = arith.constant 0.000000e+00 : f32
    %6 = vector.broadcast %cst_5 : f32 to vector<8x128xf32>
    %7 = arith.maximumf %5, %6 : vector<8x128xf32>
    %8 = arith.truncf %7 : vector<8x128xf32> to vector<8x128xbf16>
    %c0_6 = arith.constant 0 : index
    %c0_7 = arith.constant 0 : index
    %9 = vector.load %arg3[%c0_6, %c0_7] : memref<128x128xbf16, #tpu.memory_space<vmem>>, vector<128x128xbf16>
    %cst_8 = arith.constant dense<0.000000e+00> : vector<8x128xf32>
    %10 = tpu.matmul %8, %9, %cst_8 {dimension_numbers = #tpu.dot_dimension_numbers<[1], [0], [0], [1], [0, 0, 1, 1], [], []>} : vector<8x128xbf16>, vector<128x128xbf16>, vector<8x128xf32> -> vector<8x128xf32>
    %c0_9 = arith.constant 0 : index
    %c0_10 = arith.constant 0 : index
    %11 = vector.load %arg4[%c0_9, %c0_10] : memref<1x128xf32, #tpu.memory_space<vmem>>, vector<1x128xf32>
    %12 = vector.broadcast %11 : vector<1x128xf32> to vector<8x128xf32>
    %13 = arith.addf %10, %12 : vector<8x128xf32>
    %c0_11 = arith.constant 0 : index
    %c0_12 = arith.constant 0 : index
    %14 = vector.load %arg5[%c0_11, %c0_12] : memref<8x128xf32, #tpu.memory_space<vmem>>, vector<8x128xf32>
    tpu.vector_store %arg5[%c0_11, %c0_12], %13 {strides = array<i32>} : memref<8x128xf32, #tpu.memory_space<vmem>>, vector<8x128xf32>,
    return
  }
}

</mosaic_0001>

<bundles_post_ra>
// kernel: tpu_custom_call.1
= control target key start
LH: loop header
LB: loop body
LE: loop exit
PB: predicated region body
PF: predicated region fallthrough
CT: control target
= control target key end

     0   :  { %10 = vsyncpa [#allocation3], 0  ;;  %s618_s0 = inlined_call_operand.hbm [shape: bf16[8,256], index: 0, kind: input, shape index: {}]   ;;  %s619_s1 = inlined_call_operand.hbm [shape: bf16[256,128], index: 1, kind: input, shape index: {}]   ;;  %s620_s2 = inlined_call_operand.vmem [shape: f32[1,128], index: 2, kind: input, shape index: {}]   ;;  %s621_s3 = inlined_call_operand.hbm [shape: bf16[128,128], index: 3, kind: input, shape index: {}]   ;;  %s622_s4 = inlined_call_operand.vmem [shape: f32[1,128], index: 4, kind: input, shape index: {}]   ;;  %s623_s5 = inlined_call_operand.hbm [shape: f32[8,128], index: 5, kind: output, shape index: {}]  }
   0x1   :  { %11 = vsyncpa [#allocation6], 0  ;;  %s28_s20 = sshll.u32 %s619_s1, 4  ;;  %s29_s20 = int_to_ptr.hbm [resolvable:$true] %s28_s20 }
   0x2   :  { %12 = vsyncpa [#allocation4], 0  ;;  %s564_s21 = smov [#allocation5]   ;;  %s18_s25 = sshll.u32 %s618_s0, 4  ;;  %s19_s25 = int_to_ptr.hbm [resolvable:$true] %s18_s25 }
   0x3   :  { %s30_s22 = sshll.u32 %s564_s21, 4  ;;  %s565_s26 = smov 64   ;;  %s31_s22 = int_to_ptr.vmem [resolvable:$true] %s30_s22 }
   0x4   :  { %s566_s27 = smov 4   ;;  %s567_s28 = smov [#allocation2]  }
   0x5   :  { %36 = dma.hbm_to_vmem [thread:$0]  %s29_s20, 2048, %s31_s22, [#allocation6], %s565_s26, %s565_s26, %s566_s27  }
   0x6   :  { %s20_s29 = sshll.u32 %s567_s28, 4  ;;  %s43_s7 = sshll.u32 %s621_s3, 4  ;;  %s21_s29 = int_to_ptr.vmem [resolvable:$true] %s20_s29  ;;  %s44_s7 = int_to_ptr.hbm [resolvable:$true] %s43_s7 }
   0x7   :  { %23 = dma.hbm_to_vmem [thread:$0]  %s19_s25, 128, %s21_s29, [#allocation3]  }
   0x8   :  { %s568_s1 = smov [#allocation7]  }
   0x9   :  { %s45_s8 = sshll.u32 %s568_s1, 4  ;;  %s46_s8 = int_to_ptr.vmem [resolvable:$true] %s45_s8 }
   0xa   :  { %51 = dma.hbm_to_vmem [thread:$0]  %s44_s7, 1024, %s46_s8, [#allocation6], %s565_s26, %s565_s26, %s566_s27  }
   0xb   :  { %558 = dma.done.wait [#allocation3], 128  }
   0xc   :  { %559 = vsyncadd [#allocation3], 4294967168 }
   0xd   :  { %560 = dma.done.wait [#allocation6], 3072  }
   0xe   :  { %561 = vsyncadd [#allocation6], 4294964224  ;;  %v437_v0 = vld [vmem:[#allocation5 + $0x38] sm:$0xff]  ;;  %v436_v2 = vld [vmem:[#allocation5 + $0x30] sm:$0xff]  ;;  %s569_s11 = smov [#allocation8]   ;;  %s323_s15 = sshll.u32 %s623_s5, 4  ;;  %s324_s15 = int_to_ptr.hbm [resolvable:$true] %s323_s15 }
   0xf   :  { %v445_v1 = vld [vmem:[#allocation5 + $0x78] sm:$0xff]  ;;  %206 = vmatpush.bf16.msra.mxu0 %v437_v0  ;;  %v444_v3 = vld [vmem:[#allocation5 + $0x70] sm:$0xff]  ;;  %v435_v5 = vld [vmem:[#allocation5 + $0x28] sm:$0xff]  ;;  %s321_s12 = sshll.u32 %s569_s11, 4  ;;  %s322_s12 = int_to_ptr.vmem [resolvable:$true] %s321_s12 }
  0x10   :  { %219 = vmatpush.bf16.msra.mxu1 %v445_v1  ;;  %v453_v4 = vld [vmem:[#allocation7 + $0x38] sm:$0xff]  ;;  %v443_v6 = vld [vmem:[#allocation5 + $0x68] sm:$0xff]  ;;  %v452_v7 = vld [vmem:[#allocation7 + $0x30] sm:$0xff] }
  0x11   :  { %302 = vmatpush.bf16.msra.mxu2 %v453_v4  ;;  %v434_v8 = vld [vmem:[#allocation5 + $0x20] sm:$0xff]  ;;  %v451_v10 = vld [vmem:[#allocation7 + $0x28] sm:$0xff]  ;;  %v433_v11 = vld [vmem:[#allocation5 + $0x18] sm:$0xff] }
  0x12   :  { %v442_v9 = vld [vmem:[#allocation5 + $0x60] sm:$0xff]  ;;  %v441_v12 = vld [vmem:[#allocation5 + $0x58] sm:$0xff]  ;;  %v432_v14 = vld [vmem:[#allocation5 + $0x10] sm:$0xff] }
  0x13   :  { %207 = vmatpush.bf16.msra.mxu0 %v436_v2  ;;  %v450_v13 = vld [vmem:[#allocation7 + $0x20] sm:$0xff]  ;;  %v440_v15 = vld [vmem:[#allocation5 + $0x50] sm:$0xff]  ;;  %v449_v16 = vld [vmem:[#allocation7 + $0x18] sm:$0xff] }
  0x14   :  { %220 = vmatpush.bf16.msra.mxu1 %v444_v3  ;;  %v431_v17 = vld [vmem:[#allocation5 + $0x8] sm:$0xff]  ;;  %v66_v19 = vld [vmem:[#allocation2] sm:$0xff]  ;;  %v448_v20 = vld [vmem:[#allocation7 + $0x10] sm:$0xff] }
  0x15   :  { %303 = vmatpush.bf16.msra.mxu2 %v452_v7  ;;  %v439_v18 = vld [vmem:[#allocation5 + $0x48] sm:$0xff]  ;;  %v104_v21 = vunpack.c.l.b16 %v66_v19  ;;  %v105_v22 = vunpack.c.h.b16 %v66_v19  ;;  %v430_v23 = vld [vmem:[#allocation5] sm:$0xff]  ;;  %v460_v29 = vld [vmem:[%s620_s2] ss:$0 sm:$0xff] }
  0x16   :  { %v438_v24 = vld [vmem:[#allocation5 + $0x40] sm:$0xff]  ;;  %v447_v27 = vld [vmem:[#allocation7 + $0x8] sm:$0xff]  ;;  %v461_v38 = vld [vmem:[%s622_s4] ss:$0 sm:$0xff] }
  0x17   :  { %208 = vmatpush.bf16.msra.mxu0 %v435_v5  ;;  %v106_v25 = vpack.c.b16 %v104_v21, %v104_v21  ;;  %v107_v26 = vpack.c.b16 %v105_v22, %v105_v22  ;;  %v446_v28 = vld [vmem:[#allocation7] sm:$0xff] }
  0x18   :  { %221 = vmatpush.bf16.msra.mxu1 %v443_v6 }
  0x19   :  { %304 = vmatpush.bf16.msra.mxu2 %v451_v10 }
  0x1b   :  { %209 = vmatpush.bf16.msra.mxu0 %v434_v8 }
  0x1c   :  { %222 = vmatpush.bf16.msra.mxu1 %v442_v9 }
  0x1d   :  { %305 = vmatpush.bf16.msra.mxu2 %v450_v13 }
  0x1f   :  { %210 = vmatpush.bf16.msra.mxu0 %v433_v11 }
  0x20   :  { %223 = vmatpush.bf16.msra.mxu1 %v441_v12 }
  0x21   :  { %306 = vmatpush.bf16.msra.mxu2 %v449_v16 }
  0x23   :  { %211 = vmatpush.bf16.msra.mxu0 %v432_v14 }
  0x24   :  { %224 = vmatpush.bf16.msra.mxu1 %v440_v15 }
  0x25   :  { %307 = vmatpush.bf16.msra.mxu2 %v448_v20 }
  0x27   :  { %212 = vmatpush.bf16.msra.mxu0 %v431_v17 }
  0x28   :  { %225 = vmatpush.bf16.msra.mxu1 %v439_v18 }
  0x29   :  { %308 = vmatpush.bf16.msra.mxu2 %v447_v27 }
  0x2b   :  { %213 = vmatpush.bf16.msra.mxu0 %v430_v23 }
  0x2c   :  { %226 = vmatpush.bf16.msra.mxu1 %v438_v24 }
  0x2d   :  { %309 = vmatpush.bf16.msra.mxu2 %v446_v28 }
  0x2e   :  { %214 = vmatmul.bf16.vlgmr.msra.gmra.mxu0 %v106_v25 }
  0x2f   :  { %227 = vmatmul.bf16.vlgmr.msra.gmra.mxu1 %v107_v26 }
  0xab   :  { %v215_v30 = vpop.f32.mrf.mxu0 }
  0xac   :  { %v228_v31 = vpop.f32.mrf.mxu1  ;;  %v216_v32 = vadd.f32 %v460_v29, %v215_v30 }
  0xae   :  { %v229_v33 = vadd.f32 %v228_v31, %v216_v32 }
  0xb0   :  { %v232_v34 = vmax.f32 %v229_v33, 0.0 }
  0xb2   :  { %v233_v35 = vpack.c.bf16 %v232_v34, %v232_v34 }
  0xb3   :  { %v217_v36 = vpop.f32.mrf.mxu0 }
  0xb4   :  { %v230_v37 = vpop.f32.mrf.mxu1  ;;  %310 = vmatmul.bf16.vlgmr.msra.gmra.mxu2 %v233_v35 }
 0x137   :  { %v311_v39 = vpop.f32.mrf.mxu2 }
 0x138   :  { %v312_v40 = vadd.f32 %v461_v38, %v311_v39 }
 0x13a   :  { %315 = vst [vmem:[#allocation8] sm:$0xff] %v312_v40 }
 0x13b   :  { %326 = dma.vmem_to_hbm [thread:$0]  %s322_s12, 128, %s324_s15, [#allocation4]  }
 0x13f   :  { %v313_v41 = vpop.f32.mrf.mxu2 }
 0x140   :  { %562 = dma.done.wait [#allocation4], 128  }
 0x141   :  { %563 = vsyncadd [#allocation4], 4294967168 }
 0x142   :  { %331 = vsyncpa [#allocation3], 1 }
 0x143   :  { %332 = vsyncpa [#allocation6], 1 }
 0x144   :  { %333 = vsyncpa [#allocation4], 1 }

</bundles_post_ra>
